<compile_context>
chip_gen: v6e
topology: v6e:2x2x1
jax: 0.10.0
libtpu: 0.0.40
codegen_flags: <defaults>
</compile_context>

<pallas_src>
import jax
import jax.numpy as jnp
from jax.experimental import pallas as pl
from jax.experimental.pallas import tpu as pltpu

NA_PRIMITIVES = ['sage', 'sage_sum', 'sage_max', 'gcn', 'gin', 'gat', 'gat_sym',
                 'gat_cos', 'gat_linear', 'gat_generalized_linear', 'geniepath']
K = len(NA_PRIMITIVES)


# ----------------------------- Pallas kernels -----------------------------

def _proj_kernel(x_ref, w_ref, o_ref):
    # Lane-dense projection: cat = x @ [Wn_0 | ... | Wn_10 | Wr_0 | Wr_1 | Wr_2]
    # bf16 operands, f32 accumulation on the MXU.
    o_ref[...] = jnp.dot(x_ref[...], w_ref[...],
                         preferred_element_type=jnp.float32)


def wide_projection(x_bf, wcat_bf):
    """cat[N, (K+3)*Dout] = x @ Wcat  (single MXU pass, 448-wide lanes)."""
    N = x_bf.shape[0]
    Dw = wcat_bf.shape[1]
    return pl.pallas_call(
        _proj_kernel,
        out_shape=jax.ShapeDtypeStruct((N, Dw), jnp.float32),
    )(x_bf, wcat_bf)


def _make_mix_kernel(Kops, Dout):
    def kernel(w_ref, p_ref, h_ref, m2_ref, r_ref, b_ref, o_ref):
        # w_ref : SMEM (K,)            f32   mixture weights (scalar prefetch)
        # p_ref : VMEM (10, tm, N)     bf16  row tile of the 10 dense P matrices
        # h_ref : VMEM (K, N, Dout)    bf16  H_k = x @ Wn_k (full rows, resident)
        # m2_ref: VMEM (tm, Dout)      f32   sage_max neighbor term (zmax @ Wn_2)
        # r_ref : VMEM (tm, 3*Dout)    f32   SAGE root terms x @ [Wr_0|Wr_1|Wr_2]
        # b_ref : VMEM (K, 1, Dout)    f32   per-op bias (resident)
        # o_ref : VMEM (tm, Dout)      f32   output row tile
        r = r_ref[...]
        acc = jnp.zeros(o_ref.shape, jnp.float32)
        p_idx = 0
        for k in range(Kops):                       # unrolled at trace time
            if k == 2:                              # sage_max: pre-projected term
                t = m2_ref[...]
            else:
                t = jnp.dot(p_ref[p_idx], h_ref[k],
                            preferred_element_type=jnp.float32)
                p_idx += 1
            if k < 3:                               # only SAGE ops have a root term
                t = t + r[:, k * Dout:(k + 1) * Dout]
            t = t + b_ref[k]
            # ELU (alpha = 1); exponent clamped so large positive h never overflows
            e = jnp.where(t > 0, t, jnp.exp(jnp.minimum(t, 0.0)) - 1.0)
            acc = acc + w_ref[k] * e
        o_ref[...] = acc
    return kernel


def mixed_sum_fused(w, P10_bf, H_bf, M2, R, b3, tm=None):
    """out = sum_k w_k * ELU(P_k @ H_k + root_k + b_k)   (single fused kernel)."""
    Kops, N, Dout = H_bf.shape
    Kp = P10_bf.shape[0]
    if tm is None:
        tm = N if N <= 128 else 128                 # row tile (megacore-parallel)
    assert N % tm == 0

    grid_spec = pltpu.PrefetchScalarGridSpec(
        num_scalar_prefetch=1,                      # mixture weights -> SMEM
        grid=(N // tm,),
        in_specs=[
            pl.BlockSpec((Kp, tm, N), lambda i, w_ref: (0, i, 0)),       # P row tile
            pl.BlockSpec((Kops, N, Dout), lambda i, w_ref: (0, 0, 0)),   # H resident
            pl.BlockSpec((tm, Dout), lambda i, w_ref: (i, 0)),           # M2 row tile
            pl.BlockSpec((tm, 3 * Dout), lambda i, w_ref: (i, 0)),       # R row tile
            pl.BlockSpec((Kops, 1, Dout), lambda i, w_ref: (0, 0, 0)),   # b resident
        ],
        out_specs=pl.BlockSpec((tm, Dout), lambda i, w_ref: (i, 0)),
    )
    return pl.pallas_call(
        _make_mix_kernel(Kops, Dout),
        out_shape=jax.ShapeDtypeStruct((N, Dout), jnp.float32),
        grid_spec=grid_spec,
        compiler_params=pltpu.CompilerParams(
            dimension_semantics=("parallel",)),
    )(w, P10_bf, H_bf, M2, R, b3)


# ----------------------------- parameters (deterministic, synthetic) -------

def init_params(key, in_dim, out_dim):
    ks = jax.random.split(key, 8)

    def glorot(k, shape):
        lim = jnp.sqrt(6.0 / (shape[-2] + shape[-1]))
        return jax.random.uniform(k, shape, jnp.float32, -lim, lim)

    Wn = glorot(ks[0], (K, in_dim, out_dim))          # neighbor / main weight per op
    Wr = glorot(ks[1], (K, in_dim, out_dim))          # root / self weight (SAGE ops only)
    b = 0.01 * jax.random.normal(ks[2], (K, out_dim), jnp.float32)
    att_l = 0.1 * jax.random.normal(ks[3], (K, out_dim), jnp.float32)
    att_r = 0.1 * jax.random.normal(ks[4], (K, out_dim), jnp.float32)
    g_gen = 0.1 * jax.random.normal(ks[5], (out_dim,), jnp.float32)
    lin_W = glorot(ks[6], (in_dim, out_dim))          # the with_linear Linear
    lin_b = 0.01 * jax.random.normal(ks[7], (out_dim,), jnp.float32)
    # Only the 3 SAGE variants (k < 3) carry a root/self term; the fused kernel
    # exploits this structurally, so no root mask is needed.
    return dict(Wn=Wn, Wr=Wr, b=b, att_l=att_l, att_r=att_r,
                g_gen=g_gen, lin_W=lin_W, lin_b=lin_b)


# ----------------------------- forward (glue + Pallas) ---------------------

def na_mixed_op_forward(params, x, weights, edge_index,
                        with_linear=False, use_pallas=True):
    N, Din = x.shape
    Wn, Wr, b = params['Wn'], params['Wr'], params['b']
    Dout = Wn.shape[-1]

    w = weights.astype(jnp.float32)
    Wr3 = Wr[:3]
    b_eff = b
    if with_linear:
        # Faithful to the reference module: self._ops_linear is re-created inside
        # the __init__ loop, so it holds ONE Linear and zip() truncates the
        # mixture to the first primitive only, with the Linear folded in.
        w = w.at[1:].set(0.0)
        Wr3 = Wr3.at[0].add(params['lin_W'])
        b_eff = b_eff.at[0].add(params['lin_b'])

    # ---- one lane-dense projection for all neighbor + root weights (bf16) ----
    Wn_flat = jnp.transpose(Wn, (1, 0, 2)).reshape(Din, K * Dout)
    Wr_flat = jnp.transpose(Wr3, (1, 0, 2)).reshape(Din, 3 * Dout)
    Wcat_bf = jnp.concatenate([Wn_flat, Wr_flat], axis=1).astype(jnp.bfloat16)
    x_bf = x.astype(jnp.bfloat16)
    if use_pallas:
        cat = wide_projection(x_bf, Wcat_bf)                      # Pallas kernel 1
    else:
        cat = jnp.dot(x_bf, Wcat_bf, preferred_element_type=jnp.float32)
    Hf = jnp.transpose(cat[:, :K * Dout].reshape(N, K, Dout), (1, 0, 2))  # (K,N,Dout)
    R = cat[:, K * Dout:]                                                 # (N,3*Dout)

    # ---- dense propagation matrices (JAX glue over an arbitrary graph) -------
    src, dst = edge_index[0], edge_index[1]
    # A[i, j] = 1 iff edge j -> i  (aggregate incoming messages at i)
    A = jnp.zeros((N, N), jnp.float32).at[dst, src].set(1.0)
    I = jnp.eye(N, dtype=jnp.float32)
    deg = A.sum(axis=1, keepdims=True)
    P_mean = A / jnp.maximum(deg, 1.0)
    A_hat = A + I
    dinv = jax.lax.rsqrt(A_hat.sum(axis=1))
    P_gcn = dinv[:, None] * A_hat * dinv[None, :]
    mask = (A_hat > 0).astype(jnp.float32)            # attention mask w/ self loops

    def masked_softmax(e):
        e = jnp.where(mask > 0, e, -1e30)
        e = e - jnp.max(e, axis=1, keepdims=True)
        p = jnp.exp(e) * mask
        return p / jnp.maximum(p.sum(axis=1, keepdims=True), 1e-16)

    leaky = lambda v: jnp.where(v > 0, v, 0.2 * v)

    def att_matrix(k, kind):
        h = Hf[k]                                     # reuse Pallas-computed x @ Wn_k
        sl = h @ params['att_l'][k]
        sr = h @ params['att_r'][k]
        if kind == 'gat':
            e = leaky(sl[:, None] + sr[None, :])
        elif kind == 'gat_sym':
            e = leaky(sl[:, None] + sr[None, :]) + leaky(sl[None, :] + sr[:, None])
        elif kind == 'gat_cos':
            e = (h * params['att_l'][k]) @ (h * params['att_r'][k]).T
        elif kind == 'gat_linear':
            e = jnp.broadcast_to(jnp.tanh(sl + sr)[None, :], (N, N))
        elif kind == 'gat_generalized_linear':
            # TODO(synk): O(N^2*Dout) dense tensor; needs a row-tiled kernel at large N.
            t = jnp.tanh(h[:, None, :] * params['att_l'][k]
                         + h[None, :, :] * params['att_r'][k])
            e = t @ params['g_gen']
        else:  # geniepath breadth fn; TODO(synk): GeniePath LSTM depth-function omitted
            e = jnp.tanh(sl[:, None] + sr[None, :])
        return masked_softmax(e)

    # 10 propagation matrices (sage_max handled separately via M2 below)
    P10 = jnp.stack([
        P_mean,                                   # sage      (k=0)
        A,                                        # sage_sum  (k=1)
        P_gcn,                                    # gcn       (k=3)
        A + I,                                    # gin       (k=4, eps=0)
        att_matrix(5, 'gat'),
        att_matrix(6, 'gat_sym'),
        att_matrix(7, 'gat_cos'),
        att_matrix(8, 'gat_linear'),
        att_matrix(9, 'gat_generalized_linear'),
        att_matrix(10, 'geniepath'),
    ], axis=0)

    # sage_max: element-wise max over in-neighbors, projected once (JAX glue).
    # TODO(synk): dense (N,N,Din) masked-max; tile per-row for large graphs.
    neigh = jnp.where(A[:, :, None] > 0, x[None, :, :], -jnp.inf)
    zmax = jnp.max(neigh, axis=1)
    zmax = jnp.where(jnp.isfinite(zmax), zmax, 0.0)
    M2 = zmax @ Wn[2]                             # (N, Dout) f32

    P10_bf = P10.astype(jnp.bfloat16)
    H_bf = Hf.astype(jnp.bfloat16)
    b3 = b_eff.reshape(K, 1, Dout).astype(jnp.float32)

    if use_pallas:
        return mixed_sum_fused(w, P10_bf, H_bf, M2, R, b3)        # Pallas kernel 2
    # pure-JAX reference of the fused mix (same bf16 operands, f32 accumulation)
    terms = []
    p_idx = 0
    for k in range(K):
        if k == 2:
            t = M2
        else:
            t = jnp.dot(P10_bf[p_idx], H_bf[k], preferred_element_type=jnp.float32)
            p_idx += 1
        if k < 3:
            t = t + R[:, k * Dout:(k + 1) * Dout]
        t = t + b3[k]
        e = jnp.where(t > 0, t, jnp.exp(jnp.minimum(t, 0.0)) - 1.0)
        terms.append(w[k] * e)
    return sum(terms)


forward_jit = jax.jit(na_mixed_op_forward,
                      static_argnames=("with_linear", "use_pallas"))


# ----------------------------- demo -----------------------------

if __name__ == "__main__":
    key = jax.random.PRNGKey(0)
    N, Din, Dout, E = 16, 32, 32, 48
    kx, ke1, ke2, kw, kp = jax.random.split(key, 5)

    x = jax.random.normal(kx, (N, Din), jnp.float32)
    src = jax.random.randint(ke1, (E,), 0, N)
    dst = jax.random.randint(ke2, (E,), 0, N)
    edge_index = jnp.stack([src, dst], axis=0)                          # [2, E]
    weights = jax.nn.softmax(jax.random.normal(kw, (K,), jnp.float32))  # 11 arch weights
    params = init_params(kp, Din, Dout)

    out = forward_jit(params, x, weights, edge_index,
                      with_linear=False, use_pallas=True)
    out = jax.block_until_ready(out)

    ref = forward_jit(params, x, weights, edge_index,
                      with_linear=False, use_pallas=False)
    ref = jax.block_until_ready(ref)

    assert out.shape == (N, Dout)
    assert bool(jnp.all(jnp.isfinite(out)))
    assert bool(jnp.allclose(out, ref, atol=1e-2, rtol=1e-2))
    print("KERNEL_OK")
</pallas_src>

<mosaic_0001>
module attributes {stable_mosaic.version = 11 : i64} {
  func.func @_proj_kernel(%arg0: memref<16x32xbf16, #tpu.memory_space<vmem>>, %arg1: memref<32x448xbf16, #tpu.memory_space<vmem>>, %arg2: memref<16x448xf32, #tpu.memory_space<vmem>>) attributes {dimension_semantics = [], scalar_prefetch = 0 : i64, scratch_operands = 0 : i64, tpu.core_type = #tpu.core_type<tc>} {
    %c0 = arith.constant 0 : index
    %c0_0 = arith.constant 0 : index
    %0 = vector.load %arg0[%c0, %c0_0] : memref<16x32xbf16, #tpu.memory_space<vmem>>, vector<16x32xbf16>
    %c0_1 = arith.constant 0 : index
    %c0_2 = arith.constant 0 : index
    %1 = vector.load %arg1[%c0_1, %c0_2] : memref<32x448xbf16, #tpu.memory_space<vmem>>, vector<32x448xbf16>
    %cst = arith.constant dense<0.000000e+00> : vector<16x448xf32>
    %2 = tpu.matmul %0, %1, %cst {dimension_numbers = #tpu.dot_dimension_numbers<[1], [0], [0], [1], [0, 0, 1, 1], [], []>} : vector<16x32xbf16>, vector<32x448xbf16>, vector<16x448xf32> -> vector<16x448xf32>
    %c0_3 = arith.constant 0 : index
    %c0_4 = arith.constant 0 : index
    %3 = vector.load %arg2[%c0_3, %c0_4] : memref<16x448xf32, #tpu.memory_space<vmem>>, vector<16x448xf32>
    tpu.vector_store %arg2[%c0_3, %c0_4], %2 {strides = array<i32>} : memref<16x448xf32, #tpu.memory_space<vmem>>, vector<16x448xf32>,
    return
  }
}

module attributes {stable_mosaic.version = 11 : i64} {
  func.func @kernel(%arg0: i32, %arg1: memref<11xf32, #tpu.memory_space<smem>>, %arg2: memref<10x16x16xbf16, #tpu.memory_space<vmem>>, %arg3: memref<11x16x32xbf16, #tpu.memory_space<vmem>>, %arg4: memref<16x32xf32, #tpu.memory_space<vmem>>, %arg5: memref<16x96xf32, #tpu.memory_space<vmem>>, %arg6: memref<11x1x32xf32, #tpu.memory_space<vmem>>, %arg7: memref<16x32xf32, #tpu.memory_space<vmem>>) attributes {dimension_semantics = [#tpu.dimension_semantics<parallel>], iteration_bounds = array<i64: 1>, scalar_prefetch = 1 : i64, scratch_operands = 0 : i64, tpu.core_type = #tpu.core_type<tc>, window_params = [{transform_indices = @transform_0, window_bounds = array<i64: 10, 16, 16>}, {pipeline_mode = #tpu.pipeline_mode<synchronous>, transform_indices = @transform_1, window_bounds = array<i64: 11, 16, 32>}, {transform_indices = @transform_2, window_bounds = array<i64: 16, 32>}, {transform_indices = @transform_3, window_bounds = array<i64: 16, 96>}, {pipeline_mode = #tpu.pipeline_mode<synchronous>, transform_indices = @transform_4, window_bounds = array<i64: 11, 1, 32>}, {transform_indices = @transform_5, window_bounds = array<i64: 16, 32>}]} {
    %c0 = arith.constant 0 : index
    %c0_0 = arith.constant 0 : index
    %0 = vector.load %arg5[%c0, %c0_0] : memref<16x96xf32, #tpu.memory_space<vmem>>, vector<16x96xf32>
    %cst = arith.constant 0.000000e+00 : f32
    %1 = vector.broadcast %cst : f32 to vector<16x32xf32>
    %c0_1 = arith.constant 0 : index
    %c0_2 = arith.constant 0 : index
    %c0_3 = arith.constant 0 : index
    %2 = vector.load %arg2[%c0_1, %c0_2, %c0_3] : memref<10x16x16xbf16, #tpu.memory_space<vmem>>, vector<1x16x16xbf16>
    %3 = vector.shape_cast %2 : vector<1x16x16xbf16> to vector<16x16xbf16>
    %c0_4 = arith.constant 0 : index
    %c0_5 = arith.constant 0 : index
    %c0_6 = arith.constant 0 : index
    %4 = vector.load %arg3[%c0_4, %c0_5, %c0_6] : memref<11x16x32xbf16, #tpu.memory_space<vmem>>, vector<1x16x32xbf16>
    %5 = vector.shape_cast %4 : vector<1x16x32xbf16> to vector<16x32xbf16>
    %cst_7 = arith.constant dense<0.000000e+00> : vector<16x32xf32>
    %6 = tpu.matmul %3, %5, %cst_7 {dimension_numbers = #tpu.dot_dimension_numbers<[1], [0], [0], [1], [0, 0, 1, 1], [], []>} : vector<16x16xbf16>, vector<16x32xbf16>, vector<16x32xf32> -> vector<16x32xf32>
    %7 = vector.extract_strided_slice %0 {offsets = [0, 0], sizes = [16, 32], strides = [1, 1]} : vector<16x96xf32> to vector<16x32xf32>
    %8 = arith.addf %6, %7 : vector<16x32xf32>
    %c0_8 = arith.constant 0 : index
    %c0_9 = arith.constant 0 : index
    %c0_10 = arith.constant 0 : index
    %9 = vector.load %arg6[%c0_8, %c0_9, %c0_10] : memref<11x1x32xf32, #tpu.memory_space<vmem>>, vector<1x1x32xf32>
    %10 = vector.shape_cast %9 : vector<1x1x32xf32> to vector<1x32xf32>
    %11 = vector.broadcast %10 : vector<1x32xf32> to vector<16x32xf32>
    %12 = arith.addf %8, %11 : vector<16x32xf32>
    %cst_11 = arith.constant 0.000000e+00 : f32
    %13 = vector.broadcast %cst_11 : f32 to vector<16x32xf32>
    %14 = arith.cmpf ogt, %12, %13 : vector<16x32xf32>
    %cst_12 = arith.constant 0.000000e+00 : f32
    %15 = vector.broadcast %cst_12 : f32 to vector<16x32xf32>
    %16 = arith.minimumf %12, %15 : vector<16x32xf32>
    %17 = math.exp %16 : vector<16x32xf32>
    %cst_13 = arith.constant 1.000000e+00 : f32
    %18 = vector.broadcast %cst_13 : f32 to vector<16x32xf32>
    %19 = arith.subf %17, %18 : vector<16x32xf32>
    %20 = arith.select %14, %12, %19 : vector<16x32xi1>, vector<16x32xf32>
    %c0_14 = arith.constant 0 : index
    %21 = memref.load %arg1[%c0_14] : memref<11xf32, #tpu.memory_space<smem>>
    %22 = vector.broadcast %21 : f32 to vector<16x32xf32>
    %23 = arith.mulf %22, %20 : vector<16x32xf32>
    %24 = arith.addf %1, %23 : vector<16x32xf32>
    %c1 = arith.constant 1 : index
    %c0_15 = arith.constant 0 : index
    %c0_16 = arith.constant 0 : index
    %25 = vector.load %arg2[%c1, %c0_15, %c0_16] : memref<10x16x16xbf16, #tpu.memory_space<vmem>>, vector<1x16x16xbf16>
    %26 = vector.shape_cast %25 : vector<1x16x16xbf16> to vector<16x16xbf16>
    %c1_17 = arith.constant 1 : index
    %c0_18 = arith.constant 0 : index
    %c0_19 = arith.constant 0 : index
    %27 = vector.load %arg3[%c1_17, %c0_18, %c0_19] : memref<11x16x32xbf16, #tpu.memory_space<vmem>>, vector<1x16x32xbf16>
    %28 = vector.shape_cast %27 : vector<1x16x32xbf16> to vector<16x32xbf16>
    %cst_20 = arith.constant dense<0.000000e+00> : vector<16x32xf32>
    %29 = tpu.matmul %26, %28, %cst_20 {dimension_numbers = #tpu.dot_dimension_numbers<[1], [0], [0], [1], [0, 0, 1, 1], [], []>} : vector<16x16xbf16>, vector<16x32xbf16>, vector<16x32xf32> -> vector<16x32xf32>
    %30 = vector.extract_strided_slice %0 {offsets = [0, 32], sizes = [16, 32], strides = [1, 1]} : vector<16x96xf32> to vector<16x32xf32>
    %31 = arith.addf %29, %30 : vector<16x32xf32>
    %c1_21 = arith.constant 1 : index
    %c0_22 = arith.constant 0 : index
    %c0_23 = arith.constant 0 : index
    %32 = vector.load %arg6[%c1_21, %c0_22, %c0_23] : memref<11x1x32xf32, #tpu.memory_space<vmem>>, vector<1x1x32xf32>
    %33 = vector.shape_cast %32 : vector<1x1x32xf32> to vector<1x32xf32>
    %34 = vector.broadcast %33 : vector<1x32xf32> to vector<16x32xf32>
    %35 = arith.addf %31, %34 : vector<16x32xf32>
    %cst_24 = arith.constant 0.000000e+00 : f32
    %36 = vector.broadcast %cst_24 : f32 to vector<16x32xf32>
    %37 = arith.cmpf ogt, %35, %36 : vector<16x32xf32>
    %cst_25 = arith.constant 0.000000e+00 : f32
    %38 = vector.broadcast %cst_25 : f32 to vector<16x32xf32>
    %39 = arith.minimumf %35, %38 : vector<16x32xf32>
    %40 = math.exp %39 : vector<16x32xf32>
    %cst_26 = arith.constant 1.000000e+00 : f32
    %41 = vector.broadcast %cst_26 : f32 to vector<16x32xf32>
    %42 = arith.subf %40, %41 : vector<16x32xf32>
    %43 = arith.select %37, %35, %42 : vector<16x32xi1>, vector<16x32xf32>
    %c1_27 = arith.constant 1 : index
    %44 = memref.load %arg1[%c1_27] : memref<11xf32, #tpu.memory_space<smem>>
    %45 = vector.broadcast %44 : f32 to vector<16x32xf32>
    %46 = arith.mulf %45, %43 : vector<16x32xf32>
    %47 = arith.addf %24, %46 : vector<16x32xf32>
    %c0_28 = arith.constant 0 : index
    %c0_29 = arith.constant 0 : index
    %48 = vector.load %arg4[%c0_28, %c0_29] : memref<16x32xf32, #tpu.memory_space<vmem>>, vector<16x32xf32>
    %49 = vector.extract_strided_slice %0 {offsets = [0, 64], sizes = [16, 32], strides = [1, 1]} : vector<16x96xf32> to vector<16x32xf32>
    %50 = arith.addf %48, %49 : vector<16x32xf32>
    %c2 = arith.constant 2 : index
    %c0_30 = arith.constant 0 : index
    %c0_31 = arith.constant 0 : index
    %51 = vector.load %arg6[%c2, %c0_30, %c0_31] : memref<11x1x32xf32, #tpu.memory_space<vmem>>, vector<1x1x32xf32>
    %52 = vector.shape_cast %51 : vector<1x1x32xf32> to vector<1x32xf32>
    %53 = vector.broadcast %52 : vector<1x32xf32> to vector<16x32xf32>
    %54 = arith.addf %50, %53 : vector<16x32xf32>
    %cst_32 = arith.constant 0.000000e+00 : f32
    %55 = vector.broadcast %cst_32 : f32 to vector<16x32xf32>
    %56 = arith.cmpf ogt, %54, %55 : vector<16x32xf32>
    %cst_33 = arith.constant 0.000000e+00 : f32
    %57 = vector.broadcast %cst_33 : f32 to vector<16x32xf32>
    %58 = arith.minimumf %54, %57 : vector<16x32xf32>
    %59 = math.exp %58 : vector<16x32xf32>
    %cst_34 = arith.constant 1.000000e+00 : f32
    %60 = vector.broadcast %cst_34 : f32 to vector<16x32xf32>
    %61 = arith.subf %59, %60 : vector<16x32xf32>
    %62 = arith.select %56, %54, %61 : vector<16x32xi1>, vector<16x32xf32>
    %c2_35 = arith.constant 2 : index
    %63 = memref.load %arg1[%c2_35] : memref<11xf32, #tpu.memory_space<smem>>
    %64 = vector.broadcast %63 : f32 to vector<16x32xf32>
    %65 = arith.mulf %64, %62 : vector<16x32xf32>
    %66 = arith.addf %47, %65 : vector<16x32xf32>
    %c2_36 = arith.constant 2 : index
    %c0_37 = arith.constant 0 : index
    %c0_38 = arith.constant 0 : index
    %67 = vector.load %arg2[%c2_36, %c0_37, %c0_38] : memref<10x16x16xbf16, #tpu.memory_space<vmem>>, vector<1x16x16xbf16>
    %68 = vector.shape_cast %67 : vector<1x16x16xbf16> to vector<16x16xbf16>
    %c3 = arith.constant 3 : index
    %c0_39 = arith.constant 0 : index
    %c0_40 = arith.constant 0 : index
    %69 = vector.load %arg3[%c3, %c0_39, %c0_40] : memref<11x16x32xbf16, #tpu.memory_space<vmem>>, vector<1x16x32xbf16>
    %70 = vector.shape_cast %69 : vector<1x16x32xbf16> to vector<16x32xbf16>
    %cst_41 = arith.constant dense<0.000000e+00> : vector<16x32xf32>
    %71 = tpu.matmul %68, %70, %cst_41 {dimension_numbers = #tpu.dot_dimension_numbers<[1], [0], [0], [1], [0, 0, 1, 1], [], []>} : vector<16x16xbf16>, vector<16x32xbf16>, vector<16x32xf32> -> vector<16x32xf32>
    %c3_42 = arith.constant 3 : index
    %c0_43 = arith.constant 0 : index
    %c0_44 = arith.constant 0 : index
    %72 = vector.load %arg6[%c3_42, %c0_43, %c0_44] : memref<11x1x32xf32, #tpu.memory_space<vmem>>, vector<1x1x32xf32>
    %73 = vector.shape_cast %72 : vector<1x1x32xf32> to vector<1x32xf32>
    %74 = vector.broadcast %73 : vector<1x32xf32> to vector<16x32xf32>
    %75 = arith.addf %71, %74 : vector<16x32xf32>
    %cst_45 = arith.constant 0.000000e+00 : f32
    %76 = vector.broadcast %cst_45 : f32 to vector<16x32xf32>
    %77 = arith.cmpf ogt, %75, %76 : vector<16x32xf32>
    %cst_46 = arith.constant 0.000000e+00 : f32
    %78 = vector.broadcast %cst_46 : f32 to vector<16x32xf32>
    %79 = arith.minimumf %75, %78 : vector<16x32xf32>
    %80 = math.exp %79 : vector<16x32xf32>
    %cst_47 = arith.constant 1.000000e+00 : f32
    %81 = vector.broadcast %cst_47 : f32 to vector<16x32xf32>
    %82 = arith.subf %80, %81 : vector<16x32xf32>
    %83 = arith.select %77, %75, %82 : vector<16x32xi1>, vector<16x32xf32>
    %c3_48 = arith.constant 3 : index
    %84 = memref.load %arg1[%c3_48] : memref<11xf32, #tpu.memory_space<smem>>
    %85 = vector.broadcast %84 : f32 to vector<16x32xf32>
    %86 = arith.mulf %85, %83 : vector<16x32xf32>
    %87 = arith.addf %66, %86 : vector<16x32xf32>
    %c3_49 = arith.constant 3 : index
    %c0_50 = arith.constant 0 : index
    %c0_51 = arith.constant 0 : index
    %88 = vector.load %arg2[%c3_49, %c0_50, %c0_51] : memref<10x16x16xbf16, #tpu.memory_space<vmem>>, vector<1x16x16xbf16>
    %89 = vector.shape_cast %88 : vector<1x16x16xbf16> to vector<16x16xbf16>
    %c4 = arith.constant 4 : index
    %c0_52 = arith.constant 0 : index
    %c0_53 = arith.constant 0 : index
    %90 = vector.load %arg3[%c4, %c0_52, %c0_53] : memref<11x16x32xbf16, #tpu.memory_space<vmem>>, vector<1x16x32xbf16>
    %91 = vector.shape_cast %90 : vector<1x16x32xbf16> to vector<16x32xbf16>
    %cst_54 = arith.constant dense<0.000000e+00> : vector<16x32xf32>
    %92 = tpu.matmul %89, %91, %cst_54 {dimension_numbers = #tpu.dot_dimension_numbers<[1], [0], [0], [1], [0, 0, 1, 1], [], []>} : vector<16x16xbf16>, vector<16x32xbf16>, vector<16x32xf32> -> vector<16x32xf32>
    %c4_55 = arith.constant 4 : index
    %c0_56 = arith.constant 0 : index
    %c0_57 = arith.constant 0 : index
    %93 = vector.load %arg6[%c4_55, %c0_56, %c0_57] : memref<11x1x32xf32, #tpu.memory_space<vmem>>, vector<1x1x32xf32>
    %94 = vector.shape_cast %93 : vector<1x1x32xf32> to vector<1x32xf32>
    %95 = vector.broadcast %94 : vector<1x32xf32> to vector<16x32xf32>
    %96 = arith.addf %92, %95 : vector<16x32xf32>
    %cst_58 = arith.constant 0.000000e+00 : f32
    %97 = vector.broadcast %cst_58 : f32 to vector<16x32xf32>
    %98 = arith.cmpf ogt, %96, %97 : vector<16x32xf32>
    %cst_59 = arith.constant 0.000000e+00 : f32
    %99 = vector.broadcast %cst_59 : f32 to vector<16x32xf32>
    %100 = arith.minimumf %96, %99 : vector<16x32xf32>
    %101 = math.exp %100 : vector<16x32xf32>
    %cst_60 = arith.constant 1.000000e+00 : f32
    %102 = vector.broadcast %cst_60 : f32 to vector<16x32xf32>
    %103 = arith.subf %101, %102 : vector<16x32xf32>
    %104 = arith.select %98, %96, %103 : vector<16x32xi1>, vector<16x32xf32>
    %c4_61 = arith.constant 4 : index
    %105 = memref.load %arg1[%c4_61] : memref<11xf32, #tpu.memory_space<smem>>
    %106 = vector.broadcast %105 : f32 to vector<16x32xf32>
    %107 = arith.mulf %106, %104 : vector<16x32xf32>
    %108 = arith.addf %87, %107 : vector<16x32xf32>
    %c4_62 = arith.constant 4 : index
    %c0_63 = arith.constant 0 : index
    %c0_64 = arith.constant 0 : index
    %109 = vector.load %arg2[%c4_62, %c0_63, %c0_64] : memref<10x16x16xbf16, #tpu.memory_space<vmem>>, vector<1x16x16xbf16>
    %110 = vector.shape_cast %109 : vector<1x16x16xbf16> to vector<16x16xbf16>
    %c5 = arith.constant 5 : index
    %c0_65 = arith.constant 0 : index
    %c0_66 = arith.constant 0 : index
    %111 = vector.load %arg3[%c5, %c0_65, %c0_66] : memref<11x16x32xbf16, #tpu.memory_space<vmem>>, vector<1x16x32xbf16>
    %112 = vector.shape_cast %111 : vector<1x16x32xbf16> to vector<16x32xbf16>
    %cst_67 = arith.constant dense<0.000000e+00> : vector<16x32xf32>
    %113 = tpu.matmul %110, %112, %cst_67 {dimension_numbers = #tpu.dot_dimension_numbers<[1], [0], [0], [1], [0, 0, 1, 1], [], []>} : vector<16x16xbf16>, vector<16x32xbf16>, vector<16x32xf32> -> vector<16x32xf32>
    %c5_68 = arith.constant 5 : index
    %c0_69 = arith.constant 0 : index
    %c0_70 = arith.constant 0 : index
    %114 = vector.load %arg6[%c5_68, %c0_69, %c0_70] : memref<11x1x32xf32, #tpu.memory_space<vmem>>, vector<1x1x32xf32>
    %115 = vector.shape_cast %114 : vector<1x1x32xf32> to vector<1x32xf32>
    %116 = vector.broadcast %115 : vector<1x32xf32> to vector<16x32xf32>
    %117 = arith.addf %113, %116 : vector<16x32xf32>
    %cst_71 = arith.constant 0.000000e+00 : f32
    %118 = vector.broadcast %cst_71 : f32 to vector<16x32xf32>
    %119 = arith.cmpf ogt, %117, %118 : vector<16x32xf32>
    %cst_72 = arith.constant 0.000000e+00 : f32
    %120 = vector.broadcast %cst_72 : f32 to vector<16x32xf32>
    %121 = arith.minimumf %117, %120 : vector<16x32xf32>
    %122 = math.exp %121 : vector<16x32xf32>
    %cst_73 = arith.constant 1.000000e+00 : f32
    %123 = vector.broadcast %cst_73 : f32 to vector<16x32xf32>
    %124 = arith.subf %122, %123 : vector<16x32xf32>
    %125 = arith.select %119, %117, %124 : vector<16x32xi1>, vector<16x32xf32>
    %c5_74 = arith.constant 5 : index
    %126 = memref.load %arg1[%c5_74] : memref<11xf32, #tpu.memory_space<smem>>
    %127 = vector.broadcast %126 : f32 to vector<16x32xf32>
    %128 = arith.mulf %127, %125 : vector<16x32xf32>
    %129 = arith.addf %108, %128 : vector<16x32xf32>
    %c5_75 = arith.constant 5 : index
    %c0_76 = arith.constant 0 : index
    %c0_77 = arith.constant 0 : index
    %130 = vector.load %arg2[%c5_75, %c0_76, %c0_77] : memref<10x16x16xbf16, #tpu.memory_space<vmem>>, vector<1x16x16xbf16>
    %131 = vector.shape_cast %130 : vector<1x16x16xbf16> to vector<16x16xbf16>
    %c6 = arith.constant 6 : index
    %c0_78 = arith.constant 0 : index
    %c0_79 = arith.constant 0 : index
    %132 = vector.load %arg3[%c6, %c0_78, %c0_79] : memref<11x16x32xbf16, #tpu.memory_space<vmem>>, vector<1x16x32xbf16>
    %133 = vector.shape_cast %132 : vector<1x16x32xbf16> to vector<16x32xbf16>
    %cst_80 = arith.constant dense<0.000000e+00> : vector<16x32xf32>
    %134 = tpu.matmul %131, %133, %cst_80 {dimension_numbers = #tpu.dot_dimension_numbers<[1], [0], [0], [1], [0, 0, 1, 1], [], []>} : vector<16x16xbf16>, vector<16x32xbf16>, vector<16x32xf32> -> vector<16x32xf32>
    %c6_81 = arith.constant 6 : index
    %c0_82 = arith.constant 0 : index
    %c0_83 = arith.constant 0 : index
    %135 = vector.load %arg6[%c6_81, %c0_82, %c0_83] : memref<11x1x32xf32, #tpu.memory_space<vmem>>, vector<1x1x32xf32>
    %136 = vector.shape_cast %135 : vector<1x1x32xf32> to vector<1x32xf32>
    %137 = vector.broadcast %136 : vector<1x32xf32> to vector<16x32xf32>
    %138 = arith.addf %134, %137 : vector<16x32xf32>
    %cst_84 = arith.constant 0.000000e+00 : f32
    %139 = vector.broadcast %cst_84 : f32 to vector<16x32xf32>
    %140 = arith.cmpf ogt, %138, %139 : vector<16x32xf32>
    %cst_85 = arith.constant 0.000000e+00 : f32
    %141 = vector.broadcast %cst_85 : f32 to vector<16x32xf32>
    %142 = arith.minimumf %138, %141 : vector<16x32xf32>
    %143 = math.exp %142 : vector<16x32xf32>
    %cst_86 = arith.constant 1.000000e+00 : f32
    %144 = vector.broadcast %cst_86 : f32 to vector<16x32xf32>
    %145 = arith.subf %143, %144 : vector<16x32xf32>
    %146 = arith.select %140, %138, %145 : vector<16x32xi1>, vector<16x32xf32>
    %c6_87 = arith.constant 6 : index
    %147 = memref.load %arg1[%c6_87] : memref<11xf32, #tpu.memory_space<smem>>
    %148 = vector.broadcast %147 : f32 to vector<16x32xf32>
    %149 = arith.mulf %148, %146 : vector<16x32xf32>
    %150 = arith.addf %129, %149 : vector<16x32xf32>
    %c6_88 = arith.constant 6 : index
    %c0_89 = arith.constant 0 : index
    %c0_90 = arith.constant 0 : index
    %151 = vector.load %arg2[%c6_88, %c0_89, %c0_90] : memref<10x16x16xbf16, #tpu.memory_space<vmem>>, vector<1x16x16xbf16>
    %152 = vector.shape_cast %151 : vector<1x16x16xbf16> to vector<16x16xbf16>
    %c7 = arith.constant 7 : index
    %c0_91 = arith.constant 0 : index
    %c0_92 = arith.constant 0 : index
    %153 = vector.load %arg3[%c7, %c0_91, %c0_92] : memref<11x16x32xbf16, #tpu.memory_space<vmem>>, vector<1x16x32xbf16>
    %154 = vector.shape_cast %153 : vector<1x16x32xbf16> to vector<16x32xbf16>
    %cst_93 = arith.constant dense<0.000000e+00> : vector<16x32xf32>
    %155 = tpu.matmul %152, %154, %cst_93 {dimension_numbers = #tpu.dot_dimension_numbers<[1], [0], [0], [1], [0, 0, 1, 1], [], []>} : vector<16x16xbf16>, vector<16x32xbf16>, vector<16x32xf32> -> vector<16x32xf32>
    %c7_94 = arith.constant 7 : index
    %c0_95 = arith.constant 0 : index
    %c0_96 = arith.constant 0 : index
    %156 = vector.load %arg6[%c7_94, %c0_95, %c0_96] : memref<11x1x32xf32, #tpu.memory_space<vmem>>, vector<1x1x32xf32>
    %157 = vector.shape_cast %156 : vector<1x1x32xf32> to vector<1x32xf32>
    %158 = vector.broadcast %157 : vector<1x32xf32> to vector<16x32xf32>
    %159 = arith.addf %155, %158 : vector<16x32xf32>
    %cst_97 = arith.constant 0.000000e+00 : f32
    %160 = vector.broadcast %cst_97 : f32 to vector<16x32xf32>
    %161 = arith.cmpf ogt, %159, %160 : vector<16x32xf32>
    %cst_98 = arith.constant 0.000000e+00 : f32
    %162 = vector.broadcast %cst_98 : f32 to vector<16x32xf32>
    %163 = arith.minimumf %159, %162 : vector<16x32xf32>
    %164 = math.exp %163 : vector<16x32xf32>
    %cst_99 = arith.constant 1.000000e+00 : f32
    %165 = vector.broadcast %cst_99 : f32 to vector<16x32xf32>
    %166 = arith.subf %164, %165 : vector<16x32xf32>
    %167 = arith.select %161, %159, %166 : vector<16x32xi1>, vector<16x32xf32>
    %c7_100 = arith.constant 7 : index
    %168 = memref.load %arg1[%c7_100] : memref<11xf32, #tpu.memory_space<smem>>
    %169 = vector.broadcast %168 : f32 to vector<16x32xf32>
    %170 = arith.mulf %169, %167 : vector<16x32xf32>
    %171 = arith.addf %150, %170 : vector<16x32xf32>
    %c7_101 = arith.constant 7 : index
    %c0_102 = arith.constant 0 : index
    %c0_103 = arith.constant 0 : index
    %172 = vector.load %arg2[%c7_101, %c0_102, %c0_103] : memref<10x16x16xbf16, #tpu.memory_space<vmem>>, vector<1x16x16xbf16>
    %173 = vector.shape_cast %172 : vector<1x16x16xbf16> to vector<16x16xbf16>
    %c8 = arith.constant 8 : index
    %c0_104 = arith.constant 0 : index
    %c0_105 = arith.constant 0 : index
    %174 = vector.load %arg3[%c8, %c0_104, %c0_105] : memref<11x16x32xbf16, #tpu.memory_space<vmem>>, vector<1x16x32xbf16>
    %175 = vector.shape_cast %174 : vector<1x16x32xbf16> to vector<16x32xbf16>
    %cst_106 = arith.constant dense<0.000000e+00> : vector<16x32xf32>
    %176 = tpu.matmul %173, %175, %cst_106 {dimension_numbers = #tpu.dot_dimension_numbers<[1], [0], [0], [1], [0, 0, 1, 1], [], []>} : vector<16x16xbf16>, vector<16x32xbf16>, vector<16x32xf32> -> vector<16x32xf32>
    %c8_107 = arith.constant 8 : index
    %c0_108 = arith.constant 0 : index
    %c0_109 = arith.constant 0 : index
    %177 = vector.load %arg6[%c8_107, %c0_108, %c0_109] : memref<11x1x32xf32, #tpu.memory_space<vmem>>, vector<1x1x32xf32>
    %178 = vector.shape_cast %177 : vector<1x1x32xf32> to vector<1x32xf32>
    %179 = vector.broadcast %178 : vector<1x32xf32> to vector<16x32xf32>
    %180 = arith.addf %176, %179 : vector<16x32xf32>
    %cst_110 = arith.constant 0.000000e+00 : f32
    %181 = vector.broadcast %cst_110 : f32 to vector<16x32xf32>
    %182 = arith.cmpf ogt, %180, %181 : vector<16x32xf32>
    %cst_111 = arith.constant 0.000000e+00 : f32
    %183 = vector.broadcast %cst_111 : f32 to vector<16x32xf32>
    %184 = arith.minimumf %180, %183 : vector<16x32xf32>
    %185 = math.exp %184 : vector<16x32xf32>
    %cst_112 = arith.constant 1.000000e+00 : f32
    %186 = vector.broadcast %cst_112 : f32 to vector<16x32xf32>
    %187 = arith.subf %185, %186 : vector<16x32xf32>
    %188 = arith.select %182, %180, %187 : vector<16x32xi1>, vector<16x32xf32>
    %c8_113 = arith.constant 8 : index
    %189 = memref.load %arg1[%c8_113] : memref<11xf32, #tpu.memory_space<smem>>
    %190 = vector.broadcast %189 : f32 to vector<16x32xf32>
    %191 = arith.mulf %190, %188 : vector<16x32xf32>
    %192 = arith.addf %171, %191 : vector<16x32xf32>
    %c8_114 = arith.constant 8 : index
    %c0_115 = arith.constant 0 : index
    %c0_116 = arith.constant 0 : index
    %193 = vector.load %arg2[%c8_114, %c0_115, %c0_116] : memref<10x16x16xbf16, #tpu.memory_space<vmem>>, vector<1x16x16xbf16>
    %194 = vector.shape_cast %193 : vector<1x16x16xbf16> to vector<16x16xbf16>
    %c9 = arith.constant 9 : index
    %c0_117 = arith.constant 0 : index
    %c0_118 = arith.constant 0 : index
    %195 = vector.load %arg3[%c9, %c0_117, %c0_118] : memref<11x16x32xbf16, #tpu.memory_space<vmem>>, vector<1x16x32xbf16>
    %196 = vector.shape_cast %195 : vector<1x16x32xbf16> to vector<16x32xbf16>
    %cst_119 = arith.constant dense<0.000000e+00> : vector<16x32xf32>
    %197 = tpu.matmul %194, %196, %cst_119 {dimension_numbers = #tpu.dot_dimension_numbers<[1], [0], [0], [1], [0, 0, 1, 1], [], []>} : vector<16x16xbf16>, vector<16x32xbf16>, vector<16x32xf32> -> vector<16x32xf32>
    %c9_120 = arith.constant 9 : index
    %c0_121 = arith.constant 0 : index
    %c0_122 = arith.constant 0 : index
    %198 = vector.load %arg6[%c9_120, %c0_121, %c0_122] : memref<11x1x32xf32, #tpu.memory_space<vmem>>, vector<1x1x32xf32>
    %199 = vector.shape_cast %198 : vector<1x1x32xf32> to vector<1x32xf32>
    %200 = vector.broadcast %199 : vector<1x32xf32> to vector<16x32xf32>
    %201 = arith.addf %197, %200 : vector<16x32xf32>
    %cst_123 = arith.constant 0.000000e+00 : f32
    %202 = vector.broadcast %cst_123 : f32 to vector<16x32xf32>
    %203 = arith.cmpf ogt, %201, %202 : vector<16x32xf32>
    %cst_124 = arith.constant 0.000000e+00 : f32
    %204 = vector.broadcast %cst_124 : f32 to vector<16x32xf32>
    %205 = arith.minimumf %201, %204 : vector<16x32xf32>
    %206 = math.exp %205 : vector<16x32xf32>
    %cst_125 = arith.constant 1.000000e+00 : f32
    %207 = vector.broadcast %cst_125 : f32 to vector<16x32xf32>
    %208 = arith.subf %206, %207 : vector<16x32xf32>
    %209 = arith.select %203, %201, %208 : vector<16x32xi1>, vector<16x32xf32>
    %c9_126 = arith.constant 9 : index
    %210 = memref.load %arg1[%c9_126] : memref<11xf32, #tpu.memory_space<smem>>
    %211 = vector.broadcast %210 : f32 to vector<16x32xf32>
    %212 = arith.mulf %211, %209 : vector<16x32xf32>
    %213 = arith.addf %192, %212 : vector<16x32xf32>
    %c9_127 = arith.constant 9 : index
    %c0_128 = arith.constant 0 : index
    %c0_129 = arith.constant 0 : index
    %214 = vector.load %arg2[%c9_127, %c0_128, %c0_129] : memref<10x16x16xbf16, #tpu.memory_space<vmem>>, vector<1x16x16xbf16>
    %215 = vector.shape_cast %214 : vector<1x16x16xbf16> to vector<16x16xbf16>
    %c10 = arith.constant 10 : index
    %c0_130 = arith.constant 0 : index
    %c0_131 = arith.constant 0 : index
    %216 = vector.load %arg3[%c10, %c0_130, %c0_131] : memref<11x16x32xbf16, #tpu.memory_space<vmem>>, vector<1x16x32xbf16>
    %217 = vector.shape_cast %216 : vector<1x16x32xbf16> to vector<16x32xbf16>
    %cst_132 = arith.constant dense<0.000000e+00> : vector<16x32xf32>
    %218 = tpu.matmul %215, %217, %cst_132 {dimension_numbers = #tpu.dot_dimension_numbers<[1], [0], [0], [1], [0, 0, 1, 1], [], []>} : vector<16x16xbf16>, vector<16x32xbf16>, vector<16x32xf32> -> vector<16x32xf32>
    %c10_133 = arith.constant 10 : index
    %c0_134 = arith.constant 0 : index
    %c0_135 = arith.constant 0 : index
    %219 = vector.load %arg6[%c10_133, %c0_134, %c0_135] : memref<11x1x32xf32, #tpu.memory_space<vmem>>, vector<1x1x32xf32>
    %220 = vector.shape_cast %219 : vector<1x1x32xf32> to vector<1x32xf32>
    %221 = vector.broadcast %220 : vector<1x32xf32> to vector<16x32xf32>
    %222 = arith.addf %218, %221 : vector<16x32xf32>
    %cst_136 = arith.constant 0.000000e+00 : f32
    %223 = vector.broadcast %cst_136 : f32 to vector<16x32xf32>
    %224 = arith.cmpf ogt, %222, %223 : vector<16x32xf32>
    %cst_137 = arith.constant 0.000000e+00 : f32
    %225 = vector.broadcast %cst_137 : f32 to vector<16x32xf32>
    %226 = arith.minimumf %222, %225 : vector<16x32xf32>
    %227 = math.exp %226 : vector<16x32xf32>
    %cst_138 = arith.constant 1.000000e+00 : f32
    %228 = vector.broadcast %cst_138 : f32 to vector<16x32xf32>
    %229 = arith.subf %227, %228 : vector<16x32xf32>
    %230 = arith.select %224, %222, %229 : vector<16x32xi1>, vector<16x32xf32>
    %c10_139 = arith.constant 10 : index
    %231 = memref.load %arg1[%c10_139] : memref<11xf32, #tpu.memory_space<smem>>
    %232 = vector.broadcast %231 : f32 to vector<16x32xf32>
    %233 = arith.mulf %232, %230 : vector<16x32xf32>
    %234 = arith.addf %213, %233 : vector<16x32xf32>
    %c0_140 = arith.constant 0 : index
    %c0_141 = arith.constant 0 : index
    %235 = vector.load %arg7[%c0_140, %c0_141] : memref<16x32xf32, #tpu.memory_space<vmem>>, vector<16x32xf32>
    tpu.vector_store %arg7[%c0_140, %c0_141], %234 {strides = array<i32>} : memref<16x32xf32, #tpu.memory_space<vmem>>, vector<16x32xf32>,
    return
  }
  func.func @transform_0(%arg0: i32, %arg1: memref<11xf32, #tpu.memory_space<smem>>) -> (i32, i32, i32) {
    %c0_i32 = arith.constant 0 : i32
    %c0_i32_0 = arith.constant 0 : i32
    %c0_i32_1 = arith.constant 0 : i32
    return %c0_i32, %arg0, %c0_i32_0 : i32, i32, i32
  }
  func.func @transform_1(%arg0: i32, %arg1: memref<11xf32, #tpu.memory_space<smem>>) -> (i32, i32, i32) {
    %c0_i32 = arith.constant 0 : i32
    %c0_i32_0 = arith.constant 0 : i32
    %c0_i32_1 = arith.constant 0 : i32
    %c0_i32_2 = arith.constant 0 : i32
    return %c0_i32, %c0_i32_0, %c0_i32_1 : i32, i32, i32
  }
  func.func @transform_2(%arg0: i32, %arg1: memref<11xf32, #tpu.memory_space<smem>>) -> (i32, i32) {
    %c0_i32 = arith.constant 0 : i32
    %c0_i32_0 = arith.constant 0 : i32
    return %arg0, %c0_i32 : i32, i32
  }
  func.func @transform_3(%arg0: i32, %arg1: memref<11xf32, #tpu.memory_space<smem>>) -> (i32, i32) {
    %c0_i32 = arith.constant 0 : i32
    %c0_i32_0 = arith.constant 0 : i32
    return %arg0, %c0_i32 : i32, i32
  }
  func.func @transform_4(%arg0: i32, %arg1: memref<11xf32, #tpu.memory_space<smem>>) -> (i32, i32, i32) {
    %c0_i32 = arith.constant 0 : i32
    %c0_i32_0 = arith.constant 0 : i32
    %c0_i32_1 = arith.constant 0 : i32
    %c0_i32_2 = arith.constant 0 : i32
    return %c0_i32, %c0_i32_0, %c0_i32_1 : i32, i32, i32
  }
  func.func @transform_5(%arg0: i32, %arg1: memref<11xf32, #tpu.memory_space<smem>>) -> (i32, i32) {
    %c0_i32 = arith.constant 0 : i32
    %c0_i32_0 = arith.constant 0 : i32
    return %arg0, %c0_i32 : i32, i32
  }
}

</mosaic_0001>

<bundles_post_ra>
// kernel: na_mixed_op_forward.2
= control target key start
LH: loop header
LB: loop body
LE: loop exit
PB: predicated region body
PF: predicated region fallthrough
CT: control target
= control target key end

     0   :  { %v195_v1 = vmov 0   ;;  %vm67_vm0 = vcmask 261120   ;;  %vm160_vm1 = vcmask 523264   ;;  %s262_s1 = inlined_call_operand.vmem [shape: bf16[32,448], index: 1, kind: input, shape index: {}]   ;;  %s263_s0 = inlined_call_operand.vmem [shape: bf16[16,32], index: 0, kind: input, shape index: {}]   ;;  %s264_s2 = inlined_call_operand.vmem [shape: f32[16,448], index: 2, kind: output, shape index: {}]  }
   0x1   :  { %v182_v0 = vld [vmem:[%s262_s1 + $0x24] ss:$16 sps:$4 sm:$0xff]   ;;  %103 = vmatprep.mubr.bf16.mxu0 %v195_v1  ;;  %146 = vmatprep.mubr.bf16.mxu1 %v195_v1  ;;  %v184_v2 = vld [vmem:[%s262_s1 + $0x2c] ss:$16 sps:$4 sm:$0xff]   ;;  %v186_v3 = vld [vmem:[%s262_s1 + $0x20] ss:$16 sps:$4 sm:$0xff]  }
   0x2   :  { %83 = vmatprep.subr.bf16.mxu0 %v182_v0  ;;  %v187_v4 = vld [vmem:[%s262_s1 + $0x28] ss:$16 sps:$4 sm:$0xff]   ;;  %126 = vmatprep.subr.bf16.mxu1 %v184_v2  ;;  %v188_v5 = vld [vmem:[%s262_s1 + $0x4] ss:$16 sps:$4 sm:$0xff]   ;;  %v190_v6 = vld [vmem:[%s262_s1 + $0xc] ss:$16 sps:$4 sm:$0xff]  }
   0x3   :  { %84 = vmatpush1.bf16.msra.mxu0 %v186_v3  ;;  %127 = vmatpush1.bf16.msra.mxu1 %v187_v4  ;;  %v192_v7 = vld [vmem:[%s262_s1] ss:$16 sps:$4 sm:$0xff]   ;;  %v193_v8 = vld [vmem:[%s262_s1 + $0x8] ss:$16 sps:$4 sm:$0xff]  }
   0x4   :  { %85 = vmatprep.subr.bf16.mxu0 %v188_v5  ;;  %128 = vmatprep.subr.bf16.mxu1 %v190_v6  ;;  %v194_v9 = vld [vmem:[%s263_s0] sm:$0xff]  }
   0x7   :  { %86 = vmatpush1.bf16.msra.mxu0 %v192_v7  ;;  %129 = vmatpush1.bf16.msra.mxu1 %v193_v8 }
   0xa   :  { %179 = vmatmul.mubr.msk.bf16.vlgmr.msra.gmra.mxu0 %vm67_vm0, %v194_v9  ;;  %180 = vmatmul.mubr.msk.bf16.vlgmr.msra.gmra.mxu1 %vm67_vm0, %v194_v9 }
  0xca   :  { %v105_v10 = vpop.f32.mrf.mxu0  ;;  %v148_v11 = vpop.f32.mrf.mxu1 }
  0xcb   :  { %157 = vst [vmem:[%s264_s2] sm:$0xff] %v105_v10  ;;  %159 = vst [vmem:[%s264_s2 + $0x10] sm:$0xff] %v148_v11 }
  0xcc   :  { %v107_v12 = vpop.f32.mrf.mxu0  ;;  %v150_v13 = vpop.f32.mrf.mxu1 }
  0xcd   :  { %158 = vst [vmem:[%s264_s2 + $0x8] sm:$0xff] %v107_v12  ;;  %161 = vst.msk [vmem:[%s264_s2 + $0x18] sm:$0xff] %vm160_vm1, %v150_v13 }
  0xce   :  { %v109_v14 = vpop.f32.mrf.mxu0  ;;  %v152_v15 = vpop.f32.mrf.mxu1 }
  0xcf   :  { %162 = vst [vmem:[%s264_s2 + $0x20] sm:$0xff] %v109_v14  ;;  %164 = vst [vmem:[%s264_s2 + $0x30] sm:$0xff] %v152_v15 }
  0xd0   :  { %v111_v16 = vpop.f32.mrf.mxu0  ;;  %v154_v17 = vpop.f32.mrf.mxu1 }
  0xd1   :  { %163 = vst [vmem:[%s264_s2 + $0x28] sm:$0xff] %v111_v16  ;;  %165 = vst.msk [vmem:[%s264_s2 + $0x38] sm:$0xff] %vm160_vm1, %v154_v17 }

// kernel: na_mixed_op_forward.3
= control target key start
LH: loop header
LB: loop body
LE: loop exit
PB: predicated region body
PF: predicated region fallthrough
CT: control target
= control target key end

     0   :  { %s1656_s0 = inlined_call_operand.vmem [shape: f32[11], index: 0, kind: input, shape index: {}]   ;;  %s1657_s1 = inlined_call_operand.vmem [shape: bf16[10,16,16], index: 1, kind: input, shape index: {}]   ;;  %s1658_s2 = inlined_call_operand.vmem [shape: bf16[11,16,32], index: 2, kind: input, shape index: {}]   ;;  %s1659_s3 = inlined_call_operand.vmem [shape: f32[16,32], index: 3, kind: input, shape index: {}]   ;;  %s1660_s4 = inlined_call_operand.vmem [shape: f32[16,96], index: 4, kind: input, shape index: {}]   ;;  %s1661_s5 = inlined_call_operand.vmem [shape: f32[11,1,32], index: 5, kind: input, shape index: {}]   ;;  %s1662_s6 = inlined_call_operand.hbm [shape: f32[16,32], index: 6, kind: output, shape index: {}]  }
   0x1   :  { %s11_s23 = sshll.u32 %s1656_s0, 4  ;;  %s12_s23 = int_to_ptr.vmem [resolvable:$true] %s11_s23 }
   0x2   :  { %s1239_s24 = scalar_lea.vmem %s12_s23, 16  ;;  %p1244_p1 = scmp.lt.s32.totalorder %s12_s23, %s12_s23 }
   0x3   :  { %p1240_p0 = scmp.ne.s32.totalorder %s12_s23, %s1239_s24  ;;  %p1245_p2 = scmp.lt.s32.totalorder %s1239_s24, %s1239_s24 }
   0x5   :  { %p1246_p3 = por %p1245_p2, %p1244_p1 }
   0x7   :  { %p1247_p4 = pnand %p1246_p3, %p1240_p0 }
   0x9   :  { %1250 = shalt.err (!%p1247_p4)  }
   0xa   :  { %s1275_s25 = smov [#allocation3]  }
   0xb   :  { %14 = dma.vmem_to_smem %s12_s23, 16, %s1275_s25, [#allocation2] }
   0xc   :  { %1271 = dma.done.wait [#allocation2], 16 }
   0xd   :  { %1272 = vsyncadd [#allocation2], 4294967280 }
   0xe   :  { %16 = sfence }
   0xf   :  { %v1175_v0 = vld [vmem:[%s1658_s2] sm:$0xff]   ;;  %v1276_v1 = vmov 0.0   ;;  %v1176_v2 = vld [vmem:[%s1658_s2 + $0x8] sm:$0xff]   ;;  %vm1277_vm0 = vmmov 0   ;;  %vm46_vm1 = vcmask 130048   ;;  %v1179_v5 = vld [vmem:[%s1658_s2 + $0x18] sm:$0xff]  }
  0x10   :  { %1107 = vmatprep.subr.bf16.mxu0 %v1276_v1  ;;  %1113 = vmatprep.subr.bf16.mxu1 %v1276_v1  ;;  %v1177_v3 = vld [vmem:[%s1657_s1] sm:$0xff]   ;;  %v1178_v4 = vld [vmem:[%s1657_s1 + $0x8] sm:$0xff]   ;;  %v1181_v7 = vld [vmem:[%s1657_s1 + $0x10] sm:$0xff]   ;;  %s1278_s30 = smov 64  }
  0x11   :  { %1108 = vmatpush3.bf16.msra.mxu0 %v1175_v0  ;;  %1109 = vmatprep.mubr.msk.bf16.mxu0 %vm1277_vm0, %v1276_v1  ;;  %v1180_v6 = vld [vmem:[%s1658_s2 + $0x20] sm:$0xff]   ;;  %v1182_v8 = vld [vmem:[%s1657_s1 + $0x18] sm:$0xff]   ;;  %v1183_v9 = vld [vmem:[%s1658_s2 + $0x28] sm:$0xff]  }
  0x12   :  { %1114 = vmatpush3.bf16.msra.mxu1 %v1176_v2  ;;  %1115 = vmatprep.mubr.msk.bf16.mxu1 %vm1277_vm0, %v1276_v1  ;;  %v1184_v10 = vld [vmem:[%s1658_s2 + $0x30] sm:$0xff]   ;;  %v1185_v11 = vld [vmem:[%s1657_s1 + $0x20] sm:$0xff]   ;;  %v1186_v12 = vld [vmem:[%s1657_s1 + $0x28] sm:$0xff]  }
  0x13   :  { %1119 = vmatprep.subr.bf16.mxu0 %v1276_v1  ;;  %1125 = vmatprep.subr.bf16.mxu1 %v1276_v1  ;;  %v1187_v13 = vld [vmem:[%s1658_s2 + $0x38] sm:$0xff]   ;;  %v1188_v14 = vld [vmem:[%s1658_s2 + $0x40] sm:$0xff]  }
  0x14   :  { %1110 = vmatmul.mubr.msk.bf16.vlgmr.msra.gmra.mxu0 %vm46_vm1, %v1177_v3  ;;  %v29_v15 = vld [vmem:[%s1660_s4] sm:$0xff] }
  0x15   :  { %1116 = vmatmul.mubr.msk.bf16.vlgmr.msra.gmra.mxu1 %vm46_vm1, %v1178_v4  ;;  %1120 = vmatpush3.bf16.msra.mxu0 %v1179_v5 }
  0x16   :  { %1126 = vmatpush3.bf16.msra.mxu1 %v1180_v6  ;;  %1121 = vmatprep.mubr.msk.bf16.mxu0 %vm1277_vm0, %v1276_v1 }
  0x17   :  { %1127 = vmatprep.mubr.msk.bf16.mxu1 %vm1277_vm0, %v1276_v1  ;;  %1131 = vmatprep.subr.bf16.mxu0 %v1276_v1 }
  0x18   :  { %1137 = vmatprep.subr.bf16.mxu1 %v1276_v1  ;;  %217 = vrot.lane.b32.xlu1 %v29_v15, %s1278_s30 }
  0x1c   :  { %1122 = vmatmul.mubr.msk.bf16.vlgmr.msra.gmra.mxu0 %vm46_vm1, %v1181_v7 }
  0x1d   :  { %1128 = vmatmul.mubr.msk.bf16.vlgmr.msra.gmra.mxu1 %vm46_vm1, %v1182_v8  ;;  %1132 = vmatpush3.bf16.msra.mxu0 %v1183_v9 }
  0x1e   :  { %1138 = vmatpush3.bf16.msra.mxu1 %v1184_v10  ;;  %1133 = vmatprep.mubr.msk.bf16.mxu0 %vm1277_vm0, %v1276_v1 }
  0x1f   :  { %1139 = vmatprep.mubr.msk.bf16.mxu1 %vm1277_vm0, %v1276_v1  ;;  %1143 = vmatprep.subr.bf16.mxu0 %v1276_v1 }
  0x20   :  { %1149 = vmatprep.subr.bf16.mxu1 %v1276_v1 }
  0x24   :  { %1134 = vmatmul.mubr.msk.bf16.vlgmr.msra.gmra.mxu0 %vm46_vm1, %v1185_v11 }
  0x25   :  { %17 = vsyncpa [#allocation5], 0  ;;  %1140 = vmatmul.mubr.msk.bf16.vlgmr.msra.gmra.mxu1 %vm46_vm1, %v1186_v12  ;;  %1144 = vmatpush3.bf16.msra.mxu0 %v1187_v13  ;;  %v30_v16 = vld [vmem:[%s1660_s4 + $0x8] sm:$0xff]  ;;  %v1189_v17 = vld [vmem:[%s1657_s1 + $0x30] sm:$0xff]   ;;  %s1279_s11 = smov 96   ;;  %s1471_s7 = sld [smem:[#allocation3 + $0x2]] }
  0x26   :  { %1150 = vmatpush3.bf16.msra.mxu1 %v1188_v14  ;;  %1145 = vmatprep.mubr.msk.bf16.mxu0 %vm1277_vm0, %v1276_v1  ;;  %v1190_v18 = vld [vmem:[%s1657_s1 + $0x38] sm:$0xff]   ;;  %v1191_v19 = vld [vmem:[%s1658_s2 + $0x48] sm:$0xff]   ;;  %v1192_v20 = vld [vmem:[%s1658_s2 + $0x50] sm:$0xff]   ;;  %s1473_s8 = sld [smem:[#allocation3]]  ;;  %s1280_s26 = smov [#allocation4]  }
  0x27   :  { %1151 = vmatprep.mubr.msk.bf16.mxu1 %vm1277_vm0, %v1276_v1  ;;  %1155 = vmatprep.subr.bf16.mxu0 %v1276_v1  ;;  %v1193_v21 = vld [vmem:[%s1657_s1 + $0x40] sm:$0xff]   ;;  %v1194_v22 = vld [vmem:[%s1657_s1 + $0x48] sm:$0xff]   ;;  %s1477_s9 = sld [smem:[#allocation3 + $0x1]] }
  0x28   :  { %1161 = vmatprep.subr.bf16.mxu1 %v1276_v1  ;;  %137 = vrot.lane.b32.xlu0 %v29_v15, %s1279_s11  ;;  %v215_v24 = vld [vmem:[%s1659_s3] sm:$0xff]  ;;  %v216_v26 = vld [vmem:[%s1659_s3 + $0x8] sm:$0xff]  ;;  %s1485_s12 = sld [smem:[#allocation3 + $0x3]]  ;;  %s957_s3 = sshll.u32 %s1280_s26, 4  ;;  %s958_s3 = int_to_ptr.vmem [resolvable:$true] %s957_s3 }
  0x29   :  { %219 = vrot.lane.b32.xlu1 %v30_v16, %s1278_s30  ;;  %v987_v28 = vld [vmem:[%s1661_s5 + $0x2] ss:$0 sm:$0xff]  ;;  %v971_v35 = vld [vmem:[%s1661_s5] ss:$0 sm:$0xff]  ;;  %v982_v38 = vld [vmem:[%s1661_s5 + $0x1] ss:$0 sm:$0xff]  ;;  %p1256_p6 = scmp.lt.s32.totalorder %s958_s3, %s958_s3 }
  0x2a   :  { %v996_v54 = vld [vmem:[%s1661_s5 + $0x3] ss:$0 sm:$0xff]  ;;  %v1008_v59 = vld [vmem:[%s1661_s5 + $0x4] ss:$0 sm:$0xff]  ;;  %s1491_s15 = sld [smem:[#allocation3 + $0x4]]  ;;  %s1251_s27 = scalar_lea.vmem %s958_s3, 256 }
  0x2b   :  { %s1496_s4 = sld [smem:[#allocation3 + $0x5]]  ;;  %p1252_p5 = scmp.ne.s32.totalorder %s958_s3, %s1251_s27 }
  0x2c   :  { %1146 = vmatmul.mubr.msk.bf16.vlgmr.msra.gmra.mxu0 %vm46_vm1, %v1189_v17  ;;  %139 = vrot.lane.b32.xlu0 %v30_v16, %s1279_s11  ;;  %s1501_s16 = sld [smem:[#allocation3 + $0x6]]  ;;  %p1257_p7 = scmp.lt.s32.totalorder %s1251_s27, %s1251_s27 }
  0x2d   :  { %1152 = vmatmul.mubr.msk.bf16.vlgmr.msra.gmra.mxu1 %vm46_vm1, %v1190_v18  ;;  %1156 = vmatpush3.bf16.msra.mxu0 %v1191_v19  ;;  %v1032_v19 = vld [vmem:[%s1661_s5 + $0x6] ss:$0 sm:$0xff]  ;;  %s1515_s19 = sld [smem:[#allocation3 + $0x7]] }
  0x2e   :  { %1162 = vmatpush3.bf16.msra.mxu1 %v1192_v20  ;;  %1157 = vmatprep.mubr.msk.bf16.mxu0 %vm1277_vm0, %v1276_v1  ;;  %s1618_s25 = sld [smem:[#allocation3 + $0x9]]  ;;  %p1258_p8 = por %p1257_p7, %p1256_p6 }
  0x2f   :  { %1163 = vmatprep.mubr.msk.bf16.mxu1 %vm1277_vm0, %v1276_v1  ;;  %s1625_s1 = sld [smem:[#allocation3 + $0xa]] }
  0x30   :  { %p1259_p9 = pnand %p1258_p8, %p1252_p5 }
  0x34   :  { %1158 = vmatmul.mubr.msk.bf16.vlgmr.msra.gmra.mxu0 %vm46_vm1, %v1193_v21 }
  0x35   :  { %1164 = vmatmul.mubr.msk.bf16.vlgmr.msra.gmra.mxu1 %vm46_vm1, %v1194_v22 }
  0x8a   :  { %v218_v23 = vpop.permute.xlu1 %217 }
  0x8b   :  { %v223_v25 = vadd.f32 %v218_v23, %v215_v24 }
  0x8d   :  { %v1436_v30 = vadd.f32 %v987_v28, %v223_v25 }
  0x8f   :  { %v237_v33 = vmin.f32 %v1436_v30, 0.0  ;;  %vm235_vm2 = vcmp.gt.f32.partialorder %v1436_v30, 0.0 }
  0x91   :  { %v239_v45 = vmul.f32 1.442695, %v237_v33 }
  0x93   :  { %1195 = vpow2.f32 %v239_v45 }
  0x9a   :  { %v138_v31 = vpop.permute.xlu0 %137 }
  0x9b   :  { %v220_v27 = vpop.permute.xlu1 %219 }
  0x9c   :  { %v224_v29 = vadd.f32 %v220_v27, %v216_v26 }
  0x9e   :  { %v1438_v32 = vadd.f32 %v987_v28, %v224_v29  ;;  %v140_v44 = vpop.permute.xlu0 %139 }
  0xa0   :  { %v238_v42 = vmin.f32 %v1438_v32, 0.0  ;;  %v1196_v33 = vpop.eup %1195  ;;  %vm236_vm4 = vcmp.gt.f32.partialorder %v1438_v32, 0.0 }
  0xa2   :  { %v241_v56 = vmul.f32 1.442695, %v238_v42 }
  0xd4   :  { %v84_v34 = vpop.f32.mrf.mxu0 }
  0xd5   :  { %v85_v36 = vadd.f32 %v84_v34, %v29_v15  ;;  %v180_v37 = vpop.f32.mrf.mxu1 }
  0xd6   :  { %v181_v39 = vadd.f32 %v180_v37, %v138_v31  ;;  %v1111_v40 = vpop.f32.mrf.mxu0 }
  0xd7   :  { %v1447_v41 = vadd.f32 %v971_v35, %v85_v36  ;;  %v1117_v43 = vpop.f32.mrf.mxu1 }
  0xd8   :  { %v1450_v46 = vadd.f32 %v982_v38, %v181_v39  ;;  %v87_v47 = vpop.f32.mrf.mxu0  ;;  %v248_v39 = vstv %s1471_s7 }
  0xd9   :  { %v102_v48 = vmin.f32 %v1447_v41, 0.0  ;;  %v88_v49 = vadd.f32 %v87_v47, %v30_v16  ;;  %v183_v50 = vpop.f32.mrf.mxu1  ;;  %v1020_v16 = vld [vmem:[%s1661_s5 + $0x5] ss:$0 sm:$0xff]  ;;  %v113_v47 = vstv %s1473_s8  ;;  %vm100_vm3 = vcmp.gt.f32.partialorder %v1447_v41, 0.0 }
  0xda   :  { %v199_v51 = vmin.f32 %v1450_v46, 0.0  ;;  %v184_v52 = vadd.f32 %v183_v50, %v140_v44  ;;  %v1112_v53 = vpop.f32.mrf.mxu0  ;;  %v1044_v44 = vld [vmem:[%s1661_s5 + $0x7] ss:$0 sm:$0xff]  ;;  %vm197_vm5 = vcmp.gt.f32.partialorder %v1450_v46, 0.0 }
  0xdb   :  { %v104_v55 = vmul.f32 1.442695, %v102_v48  ;;  %v1457_v57 = vadd.f32 %v971_v35, %v88_v49  ;;  %v1118_v58 = vpop.f32.mrf.mxu1  ;;  %v210_v48 = vstv %s1477_s9  ;;  %v988_v53 = vadd.f32 -1.0, %v1196_v33 }
  0xdc   :  { %v201_v60 = vmul.f32 1.442695, %v199_v51  ;;  %v1462_v61 = vadd.f32 %v982_v38, %v184_v52  ;;  %v315_v62 = vpop.f32.mrf.mxu0  ;;  %v1520_v51 = vld [vmem:[%s1661_s5 + $0x8] ss:$0 sm:$0xff] }
  0xdd   :  { %1197 = vpow2.f32 %v104_v55  ;;  %v103_v63 = vmin.f32 %v1457_v57, 0.0  ;;  %v1465_v0 = vadd.f32 %v996_v54, %v315_v62  ;;  %v402_v1 = vpop.f32.mrf.mxu1  ;;  %v422_v55 = vstv %s1491_s15 }
  0xde   :  { %1199 = vpow2.f32 %v201_v60  ;;  %v200_v2 = vmin.f32 %v1462_v61, 0.0  ;;  %v1468_v3 = vadd.f32 %v1008_v59, %v402_v1  ;;  %v1123_v4 = vpop.f32.mrf.mxu0  ;;  %vm101_vm6 = vcmp.gt.f32.partialorder %v1457_v57, 0.0 }
  0xdf   :  { %1201 = vpow2.f32 %v241_v56  ;;  %v106_v5 = vmul.f32 1.442695, %v103_v63  ;;  %v324_v6 = vmin.f32 %v1465_v0, 0.0  ;;  %v1129_v7 = vpop.f32.mrf.mxu1  ;;  %vm198_vm7 = vcmp.gt.f32.partialorder %v1462_v61, 0.0 }
  0xe0   :  { %v203_v8 = vmul.f32 1.442695, %v200_v2  ;;  %v318_v9 = vpop.f32.mrf.mxu0  ;;  %v411_v13 = vmin.f32 %v1468_v3, 0.0  ;;  %vm322_vm8 = vcmp.gt.f32.partialorder %v1465_v0, 0.0  ;;  %vm409_vm9 = vcmp.gt.f32.partialorder %v1468_v3, 0.0 }
  0xe1   :  { %v326_v10 = vmul.f32 1.442695, %v324_v6  ;;  %v1475_v11 = vadd.f32 %v996_v54, %v318_v9  ;;  %v405_v12 = vpop.f32.mrf.mxu1  ;;  %1203 = vpow2.f32 %v106_v5  ;;  %v335_v54 = vstv %s1485_s12 }
  0xe2   :  { %v1480_v14 = vadd.f32 %v1008_v59, %v405_v12  ;;  %v1124_v15 = vpop.f32.mrf.mxu0  ;;  %1205 = vpow2.f32 %v203_v8  ;;  %v413_v24 = vmul.f32 1.442695, %v411_v13  ;;  %v509_v8 = vstv %s1496_s4 }
  0xe3   :  { %v325_v17 = vmin.f32 %v1475_v11, 0.0  ;;  %v1130_v18 = vpop.f32.mrf.mxu1  ;;  %1207 = vpow2.f32 %v326_v10  ;;  %v596_v9 = vstv %s1501_s16  ;;  %v245_v13 = vsel %vm235_vm2, %v1436_v30, %v988_v53 }
  0xe4   :  { %v489_v20 = vpop.f32.mrf.mxu0  ;;  %v412_v25 = vmin.f32 %v1480_v14, 0.0  ;;  %vm323_vm10 = vcmp.gt.f32.partialorder %v1475_v11, 0.0  ;;  %vm410_vm11 = vcmp.gt.f32.partialorder %v1480_v14, 0.0 }
  0xe5   :  { %v328_v21 = vmul.f32 1.442695, %v325_v17  ;;  %v1493_v22 = vadd.f32 %v1020_v16, %v489_v20  ;;  %v576_v23 = vpop.f32.mrf.mxu1 }
  0xe6   :  { %v1498_v26 = vadd.f32 %v1032_v19, %v576_v23  ;;  %v1135_v27 = vpop.f32.mrf.mxu0  ;;  %v415_v40 = vmul.f32 1.442695, %v412_v25 }
  0xe7   :  { %v498_v28 = vmin.f32 %v1493_v22, 0.0  ;;  %v1141_v29 = vpop.f32.mrf.mxu1  ;;  %1209 = vpow2.f32 %v328_v21  ;;  %vm496_vm12 = vcmp.gt.f32.partialorder %v1493_v22, 0.0 }
  0xe8   :  { %v492_v31 = vpop.f32.mrf.mxu0  ;;  %v585_v35 = vmin.f32 %v1498_v26, 0.0  ;;  %1211 = vpow2.f32 %v413_v24  ;;  %v683_v29 = vstv %s1515_s19  ;;  %vm583_vm14 = vcmp.gt.f32.partialorder %v1498_v26, 0.0 }
  0xe9   :  { %v500_v34 = vmul.f32 1.442695, %v498_v28  ;;  %v1504_v36 = vadd.f32 %v1020_v16, %v492_v31  ;;  %v579_v37 = vpop.f32.mrf.mxu1 }
  0xea   :  { %v1198_v38 = vpop.eup %1197  ;;  %v1507_v42 = vadd.f32 %v1032_v19, %v579_v37  ;;  %v1136_v43 = vpop.f32.mrf.mxu0  ;;  %v587_v58 = vmul.f32 1.442695, %v585_v35 }
  0xeb   :  { %v1200_v45 = vpop.eup %1199  ;;  %1213 = vpow2.f32 %v500_v34  ;;  %v499_v49 = vmin.f32 %v1504_v36, 0.0  ;;  %v1142_v50 = vpop.f32.mrf.mxu1  ;;  %v972_v1 = vadd.f32 -1.0, %v1198_v38  ;;  %v249_v34 = vmul.f32 %v248_v39, %v245_v13 }
  0xec   :  { %v1202_v52 = vpop.eup %1201  ;;  %v663_v56 = vpop.f32.mrf.mxu0  ;;  %v586_v60 = vmin.f32 %v1507_v42, 0.0  ;;  %v983_v2 = vadd.f32 -1.0, %v1200_v45  ;;  %1215 = vpow2.f32 %v415_v40  ;;  %vm497_vm13 = vcmp.gt.f32.partialorder %v1504_v36, 0.0 }
  0xed   :  { %v502_v59 = vmul.f32 1.442695, %v499_v49  ;;  %v1526_v62 = vadd.f32 %v1044_v44, %v663_v56  ;;  %v750_v63 = vpop.f32.mrf.mxu1  ;;  %v989_v7 = vadd.f32 -1.0, %v1202_v52  ;;  %v110_v21 = vsel %vm100_vm3, %v1447_v41, %v972_v1 }
  0xee   :  { %v1529_v4 = vadd.f32 %v1520_v51, %v750_v63  ;;  %v1147_v5 = vpop.f32.mrf.mxu0  ;;  %v1204_v6 = vpop.eup %1203  ;;  %v589_v17 = vmul.f32 1.442695, %v586_v60  ;;  %v207_v30 = vsel %vm197_vm5, %v1450_v46, %v983_v2  ;;  %v1068_v46 = vld [vmem:[%s1661_s5 + $0x9] ss:$0 sm:$0xff]  ;;  %v114_v37 = vmul.f32 %v113_v47, %v110_v21 }
  0xef   :  { %1217 = vpow2.f32 %v502_v59  ;;  %v1153_v10 = vpop.f32.mrf.mxu1  ;;  %v1206_v12 = vpop.eup %1205  ;;  %v672_v15 = vmin.f32 %v1526_v62, 0.0  ;;  %v973_v23 = vadd.f32 -1.0, %v1204_v6  ;;  %v246_v27 = vsel %vm236_vm4, %v1438_v32, %v989_v7 }
  0xf0   :  { %v666_v16 = vpop.f32.mrf.mxu0  ;;  %1219 = vpow2.f32 %v587_v58  ;;  %v759_v18 = vmin.f32 %v1529_v4, 0.0  ;;  %v1208_v20 = vpop.eup %1207  ;;  %v984_v28 = vadd.f32 -1.0, %v1206_v12  ;;  %v211_v32 = vmul.f32 %v210_v48, %v207_v30 }
  0xf1   :  { %v753_v19 = vpop.f32.mrf.mxu1  ;;  %v674_v24 = vmul.f32 1.442695, %v672_v15  ;;  %v1548_v41 = vadd.f32 %v1044_v44, %v666_v16  ;;  %v1000_v38 = vadd.f32 -1.0, %v1208_v20  ;;  %v250_v45 = vmul.f32 %v248_v39, %v246_v27 }
  0xf2   :  { %v1148_v25 = vpop.f32.mrf.mxu0  ;;  %v761_v31 = vmul.f32 1.442695, %v759_v18  ;;  %v111_v49 = vsel %vm101_vm6, %v1457_v57, %v973_v23  ;;  %v208_v53 = vsel %vm198_vm7, %v1462_v61, %v984_v28  ;;  %v1564_v56 = vadd.f32 %v1520_v51, %v753_v19  ;;  %v1080_v57 = vld [vmem:[%s1661_s5 + $0xa] ss:$0 sm:$0xff]  ;;  %s1611_s5 = sld [smem:[#allocation3 + $0x8]] }
  0xf3   :  { %v1154_v33 = vpop.f32.mrf.mxu1  ;;  %1221 = vpow2.f32 %v674_v24  ;;  %v673_v44 = vmin.f32 %v1548_v41, 0.0  ;;  %v213_v63 = vadd.f32 %v211_v32, %v114_v37  ;;  %v332_v51 = vsel %vm322_vm8, %v1465_v0, %v1000_v38 }
  0xf4   :  { %v837_v35 = vpop.f32.mrf.mxu0  ;;  %1223 = vpow2.f32 %v589_v17  ;;  %v1210_v43 = vpop.eup %1209  ;;  %v760_v2 = vmin.f32 %v1564_v56, 0.0  ;;  %v115_v6 = vmul.f32 %v113_v47, %v111_v49  ;;  %v212_v7 = vmul.f32 %v210_v48, %v208_v53 }
  0xf5   :  { %v924_v40 = vpop.f32.mrf.mxu1  ;;  %v1212_v52 = vpop.eup %1211  ;;  %1225 = vpow2.f32 %v761_v31  ;;  %v1566_v58 = vadd.f32 %v1068_v46, %v837_v35  ;;  %v676_v61 = vmul.f32 1.442695, %v673_v44  ;;  %v1001_v1 = vadd.f32 -1.0, %v1210_v43 }
  0xf6   :  { %v1159_v50 = vpop.f32.mrf.mxu0  ;;  %v1012_v10 = vadd.f32 -1.0, %v1212_v52  ;;  %v763_v16 = vmul.f32 1.442695, %v760_v2  ;;  %v1581_v18 = vadd.f32 %v1080_v57, %v924_v40  ;;  %v336_v20 = vmul.f32 %v335_v54, %v332_v51 }
  0xf7   :  { %v1165_v39 = vpop.f32.mrf.mxu1  ;;  %1227 = vpow2.f32 %v676_v61  ;;  %v846_v17 = vmin.f32 %v1566_v58, 0.0  ;;  %v251_v48 = vadd.f32 %v249_v34, %v213_v63  ;;  %v333_v21 = vsel %vm323_vm10, %v1475_v11, %v1001_v1 }
  0xf8   :  { %v1214_v59 = vpop.eup %1213  ;;  %v840_v60 = vpop.f32.mrf.mxu0  ;;  %1229 = vpow2.f32 %v763_v16  ;;  %v214_v24 = vadd.f32 %v212_v7, %v115_v6  ;;  %v419_v25 = vsel %vm409_vm9, %v1468_v3, %v1012_v10  ;;  %v933_v28 = vmin.f32 %v1581_v18, 0.0 }
  0xf9   :  { %v927_v5 = vpop.f32.mrf.mxu1  ;;  %v1216_v13 = vpop.eup %1215  ;;  %v1024_v15 = vadd.f32 -1.0, %v1214_v59  ;;  %v1587_v47 = vadd.f32 %v1068_v46, %v840_v60  ;;  %v848_v30 = vmul.f32 1.442695, %v846_v17  ;;  %v338_v11 = vadd.f32 %v336_v20, %v251_v48 }
  0xfa   :  { %v1160_v12 = vpop.f32.mrf.mxu0  ;;  %v1013_v27 = vadd.f32 -1.0, %v1216_v13  ;;  %v337_v46 = vmul.f32 %v335_v54, %v333_v21  ;;  %v935_v35 = vmul.f32 1.442695, %v933_v28  ;;  %v423_v32 = vmul.f32 %v422_v55, %v419_v25 }
  0xfb   :  { %v1166_v0 = vpop.f32.mrf.mxu1  ;;  %v506_v31 = vsel %vm496_vm12, %v1493_v22, %v1024_v15  ;;  %1231 = vpow2.f32 %v848_v30  ;;  %v847_v34 = vmin.f32 %v1587_v47, 0.0  ;;  %v1603_v40 = vadd.f32 %v1080_v57, %v927_v5 }
  0xfc   :  { %v1218_v19 = vpop.eup %1217  ;;  %v252_v49 = vadd.f32 %v250_v45, %v214_v24  ;;  %v510_v22 = vmul.f32 %v509_v8, %v506_v31  ;;  %1233 = vpow2.f32 %v935_v35  ;;  %v420_v54 = vsel %vm410_vm11, %v1480_v14, %v1013_v27 }
  0xfd   :  { %v1220_v23 = vpop.eup %1219  ;;  %v1025_v33 = vadd.f32 -1.0, %v1218_v19  ;;  %v850_v38 = vmul.f32 1.442695, %v847_v34  ;;  %v934_v52 = vmin.f32 %v1603_v40, 0.0  ;;  %v425_v57 = vadd.f32 %v423_v32, %v338_v11 }
  0xfe   :  { %v1036_v3 = vadd.f32 -1.0, %v1220_v23  ;;  %v339_v45 = vadd.f32 %v337_v46, %v252_v49  ;;  %vm670_vm15 = vcmp.gt.f32.partialorder %v1526_v62, 0.0  ;;  %v424_v61 = vmul.f32 %v422_v55, %v420_v54 }
  0xff   :  { %v507_v50 = vsel %vm497_vm13, %v1504_v36, %v1025_v33  ;;  %1235 = vpow2.f32 %v850_v38  ;;  %v937_v59 = vmul.f32 1.442695, %v934_v52  ;;  %v512_v60 = vadd.f32 %v510_v22, %v425_v57 }
 0x100   :  { %v1222_v37 = vpop.eup %1221  ;;  %v593_v39 = vsel %vm583_vm14, %v1498_v26, %v1036_v3  ;;  %v511_v63 = vmul.f32 %v509_v8, %v507_v50  ;;  %vm584_vm0 = vcmp.gt.f32.partialorder %v1507_v42, 0.0  ;;  %v426_v26 = vadd.f32 %v424_v61, %v339_v45 }
 0x101   :  { %v1224_v43 = vpop.eup %1223  ;;  %v1048_v44 = vadd.f32 -1.0, %v1222_v37  ;;  %1237 = vpow2.f32 %v937_v59  ;;  %vm671_vm1 = vcmp.gt.f32.partialorder %v1548_v41, 0.0  ;;  %vm757_vm2 = vcmp.gt.f32.partialorder %v1529_v4, 0.0 }
 0x102   :  { %v1226_v53 = vpop.eup %1225  ;;  %v1037_v14 = vadd.f32 -1.0, %v1224_v43  ;;  %v513_v7 = vadd.f32 %v511_v63, %v426_v26  ;;  %v770_v13 = vstv %s1611_s5  ;;  %v857_v20 = vstv %s1618_s25 }
 0x103   :  { %v680_v36 = vsel %vm670_vm15, %v1526_v62, %v1048_v44  ;;  %v1060_v1 = vadd.f32 -1.0, %v1226_v53  ;;  %v597_v62 = vmul.f32 %v596_v9, %v593_v39  ;;  %vm758_vm3 = vcmp.gt.f32.partialorder %v1564_v56, 0.0 }
 0x104   :  { %v1228_v51 = vpop.eup %1227  ;;  %v684_v2 = vmul.f32 %v683_v29, %v680_v36  ;;  %v594_v55 = vsel %vm584_vm0, %v1507_v42, %v1037_v14  ;;  %vm844_vm4 = vcmp.gt.f32.partialorder %v1566_v58, 0.0  ;;  %v944_v23 = vstv %s1625_s1 }
 0x105   :  { %v1049_v5 = vadd.f32 -1.0, %v1228_v51  ;;  %v1230_v8 = vpop.eup %1229  ;;  %v599_v6 = vadd.f32 %v597_v62, %v512_v60  ;;  %v767_v12 = vsel %vm757_vm2, %v1529_v4, %v1060_v1  ;;  %v598_v17 = vmul.f32 %v596_v9, %v594_v55 }
 0x106   :  { %v1061_v15 = vadd.f32 -1.0, %v1230_v8  ;;  %v771_v21 = vmul.f32 %v770_v13, %v767_v12  ;;  %vm931_vm5 = vcmp.gt.f32.partialorder %v1581_v18, 0.0  ;;  %vm845_vm6 = vcmp.gt.f32.partialorder %v1587_v47, 0.0 }
 0x107   :  { %v681_v10 = vsel %vm671_vm1, %v1548_v41, %v1049_v5  ;;  %v686_v0 = vadd.f32 %v684_v2, %v599_v6  ;;  %v600_v48 = vadd.f32 %v598_v17, %v513_v7  ;;  %vm949_vm7 = vcmask 261120  }
 0x108   :  { %v1232_v16 = vpop.eup %1231  ;;  %v685_v42 = vmul.f32 %v683_v29, %v681_v10  ;;  %v768_v4 = vsel %vm758_vm3, %v1564_v56, %v1061_v15  ;;  %vm932_vm8 = vcmp.gt.f32.partialorder %v1603_v40, 0.0 }
 0x109   :  { %v1072_v19 = vadd.f32 -1.0, %v1232_v16  ;;  %v1234_v41 = vpop.eup %1233  ;;  %v773_v25 = vadd.f32 %v771_v21, %v686_v0  ;;  %v772_v31 = vmul.f32 %v770_v13, %v768_v4 }
 0x10a   :  { %v687_v9 = vadd.f32 %v685_v42, %v600_v48  ;;  %v1084_v28 = vadd.f32 -1.0, %v1234_v41 }
 0x10b   :  { %v854_v30 = vsel %vm844_vm4, %v1566_v58, %v1072_v19 }
 0x10c   :  { %v1236_v24 = vpop.eup %1235  ;;  %v858_v27 = vmul.f32 %v857_v20, %v854_v30  ;;  %v941_v34 = vsel %vm931_vm5, %v1581_v18, %v1084_v28  ;;  %v774_v58 = vadd.f32 %v772_v31, %v687_v9 }
 0x10d   :  { %v1073_v29 = vadd.f32 -1.0, %v1236_v24  ;;  %v945_v11 = vmul.f32 %v944_v23, %v941_v34 }
 0x10e   :  { %v860_v33 = vadd.f32 %v858_v27, %v773_v25  ;;  %v1238_v46 = vpop.eup %1237 }
 0x10f   :  { %v855_v56 = vsel %vm845_vm6, %v1587_v47, %v1073_v29  ;;  %v1085_v32 = vadd.f32 -1.0, %v1238_v46 }
 0x110   :  { %v859_v35 = vmul.f32 %v857_v20, %v855_v56  ;;  %v947_v37 = vadd.f32 %v945_v11, %v860_v33 }
 0x111   :  { %v942_v38 = vsel %vm932_vm8, %v1603_v40, %v1085_v32 }
 0x112   :  { %v861_v3 = vadd.f32 %v859_v35, %v774_v58  ;;  %950 = vst.msk [vmem:[#allocation4] sm:$0xff] %vm949_vm7, %v947_v37  ;;  %v946_v18 = vmul.f32 %v944_v23, %v942_v38 }
 0x114   :  { %v948_v43 = vadd.f32 %v946_v18, %v861_v3 }
 0x116   :  { %951 = vst.msk [vmem:[#allocation4 + $0x8] sm:$0xff] %vm949_vm7, %v948_v43 }
 0x117   :  { %1262 = shalt.err (!%p1259_p9)
}
 0x118   :  { %s1281_s0 = smov 128   ;;  %s1282_s28 = smov 8  }
 0x119   :  { %963 = dma.vmem_to_hbm [thread:$0]  %s958_s3, 256, %s1662_s6, [#allocation5], %s1281_s0, %s1281_s0, %s1282_s28  }
 0x11a   :  { %1273 = dma.done.wait [#allocation5], 256  }
 0x11b   :  { %1274 = vsyncadd [#allocation5], 4294967040 }
 0x11c   :  { %967 = vsyncpa [#allocation5], 1 }

</bundles_post_ra>
